<compile_context>
chip_gen: v7x
topology: tpu7x:2x2x1
jax: 0.10.0
libtpu: 0.0.40
codegen_flags: <defaults>
</compile_context>

<pallas_src>
import functools

import numpy as np
import jax
import jax.numpy as jnp
from jax.experimental import pallas as pl
from jax.experimental.pallas import tpu as pltpu

# ---- constants from MelCompute.__init__ -------------------------------------
SAMPLE_RATE = 16000
N_FFT = 400
N_MELS = 80
HOP_LENGTH = 160
CHUNK_LENGTH = 30
N_SAMPLES = CHUNK_LENGTH * SAMPLE_RATE           # 480000
N_FRAMES = N_SAMPLES // HOP_LENGTH               # 3000  (exact_div)
N_FREQ = N_FFT // 2 + 1                          # 201 rfft bins

# TPU-friendly padded sizes (zero padding, provably does not change results)
F_PAD = 256              # 201 -> 256 frequency bins
RI_PAD = 2 * F_PAD       # real||imag concatenated RHS width (512)
M_PAD = 128              # 80  -> 128 mel channels
K_FUSED = 3 * HOP_LENGTH  # 480: fused contraction depth (3 hop rows)
# Frame rows per grid step.  512 keeps 6 even grid steps for 30 s audio
# (balanced across v7x's 2 TensorCores); on single-core v5e/v6e 1024 would
# shave ~1 us of grid overhead but 512 is within noise there.
MAX_TM = 512


def _round_up(x, m):
    return ((x + m - 1) // m) * m


# ---- deterministic parameter setup (replaces mel_filters.npz load) ----------
def _mel_filterbank(sr=SAMPLE_RATE, n_fft=N_FFT, n_mels=N_MELS):
    """Slaney-style mel filterbank (librosa.filters.mel default), float32."""
    n_freq = n_fft // 2 + 1
    fft_freqs = np.linspace(0.0, sr / 2.0, n_freq)

    def hz_to_mel(f):
        f = np.asarray(f, dtype=np.float64)
        f_sp = 200.0 / 3.0
        mels = f / f_sp
        min_log_hz = 1000.0
        min_log_mel = min_log_hz / f_sp
        logstep = np.log(6.4) / 27.0
        return np.where(f >= min_log_hz,
                        min_log_mel + np.log(np.maximum(f, min_log_hz) / min_log_hz) / logstep,
                        mels)

    def mel_to_hz(m):
        m = np.asarray(m, dtype=np.float64)
        f_sp = 200.0 / 3.0
        freqs = f_sp * m
        min_log_hz = 1000.0
        min_log_mel = min_log_hz / f_sp
        logstep = np.log(6.4) / 27.0
        return np.where(m >= min_log_mel,
                        min_log_hz * np.exp(logstep * (m - min_log_mel)),
                        freqs)

    mel_pts = mel_to_hz(np.linspace(hz_to_mel(0.0), hz_to_mel(sr / 2.0), n_mels + 2))
    fdiff = np.diff(mel_pts)
    ramps = mel_pts[:, None] - fft_freqs[None, :]
    lower = -ramps[:-2] / fdiff[:-1, None]
    upper = ramps[2:] / fdiff[1:, None]
    weights = np.maximum(0.0, np.minimum(lower, upper))
    enorm = 2.0 / (mel_pts[2:n_mels + 2] - mel_pts[:n_mels])
    weights *= enorm[:, None]
    return weights.astype(np.float32)               # (80, 201)


def _hann_window(n=N_FFT):
    # torch.hann_window(N_FFT) is periodic
    return (0.5 - 0.5 * np.cos(2.0 * np.pi * np.arange(n) / n)).astype(np.float32)


def _dft_basis_f64():
    """Hann-window-folded rFFT bases (cos, -sin), each (400, 201), float64."""
    n = np.arange(N_FFT, dtype=np.float64)[:, None]
    k = np.arange(N_FREQ, dtype=np.float64)[None, :]
    ang = 2.0 * np.pi * n * k / N_FFT
    win = _hann_window().astype(np.float64)[:, None]
    return np.cos(ang) * win, -np.sin(ang) * win


def _fused_basis_bf16():
    """Single (480, 512) window-folded real||imag DFT basis, bfloat16.

    Rows 0..399 hold the windowed basis; rows 400..479 are zero so that the
    480-sample hop-aligned frame slab (X[t] || X[t+1] || X[t+2]) reproduces
    the 400-sample windowed rFFT exactly.
    """
    bc, bs = _dft_basis_f64()
    B = np.zeros((K_FUSED, RI_PAD), np.float32)
    B[:N_FFT, :N_FREQ] = bc.astype(np.float32)
    B[:N_FFT, F_PAD:F_PAD + N_FREQ] = bs.astype(np.float32)
    return jnp.asarray(B, dtype=jnp.bfloat16)


# ---- the Pallas kernel (hot path) --------------------------------------------
def _mel_kernel(x_ref, b_ref, melt_ref, out_ref):
    # Fused windowed rFFT: one (TM,480)x(480,512) bf16 MXU matmul, f32 acc.
    ri = jnp.dot(x_ref[...], b_ref[...], preferred_element_type=jnp.float32)
    re = ri[:, :F_PAD]
    im = ri[:, F_PAD:]
    mag = re * re + im * im                                          # |STFT|^2 (VPU, f32)
    # Mel projection: (TM,256)x(256,128) bf16 MXU matmul, f32 acc.
    mel = jnp.dot(mag.astype(jnp.bfloat16), melt_ref[...],
                  preferred_element_type=jnp.float32)
    log_spec = jnp.log10(jnp.maximum(mel, 1e-10))                    # clamp(1e-10).log10()
    # Store transposed (mel-major, time in lanes): lane-dense output block and
    # no separate XLA transpose pass in the epilogue.  XLU has plenty of slack.
    out_ref[...] = log_spec.T


# ---- jitted forward (framing + pallas_call + cheap epilogue) ------------------
@functools.partial(jax.jit, static_argnames=())
def _mel_forward(audio, basis, melt):
    L = audio.shape[0]
    T = L // HOP_LENGTH                             # frames kept after stft[:, :-1]
    TM = min(MAX_TM, _round_up(max(T, 1), 128))     # rows per grid step (128-aligned)
    T_pad = _round_up(max(T, 1), TM)
    grid = (T_pad // TM,)

    # torch.stft(center=True) reflect padding; then express framing as a
    # reshape into hop-sized rows and a 3-way concat (no gather, no int index
    # tensor, no duplicated 400-wide frames array).
    pad = N_FFT // 2
    x = jnp.pad(audio.astype(jnp.float32), (pad, pad), mode="reflect")
    total = (T_pad + 2) * HOP_LENGTH
    # Truncation only drops reflect-tail samples never used by valid frames.
    x = jnp.pad(x, (0, max(0, total - x.shape[0])))[:total]
    X = x.astype(jnp.bfloat16).reshape(T_pad + 2, HOP_LENGTH)   # (T_pad+2, 160) bf16
    xcat = jnp.concatenate([X[0:T_pad], X[1:T_pad + 1], X[2:T_pad + 2]],
                           axis=1)                               # (T_pad, 480) bf16

    out = pl.pallas_call(
        _mel_kernel,
        out_shape=jax.ShapeDtypeStruct((M_PAD, T_pad), jnp.float32),
        grid=grid,
        in_specs=[
            pl.BlockSpec((TM, K_FUSED), lambda i: (i, 0)),          # frames slab
            pl.BlockSpec((K_FUSED, RI_PAD), lambda i: (0, 0)),      # constants: DMA'd once,
            pl.BlockSpec((F_PAD, M_PAD), lambda i: (0, 0)),         # VMEM-resident
        ],
        out_specs=pl.BlockSpec((M_PAD, TM), lambda i: (0, i)),      # transposed, lane-dense
        compiler_params=pltpu.CompilerParams(
            dimension_semantics=("parallel",),       # megacore-shardable on v7x
            vmem_limit_bytes=16 * 1024 * 1024),      # actual footprint ~5 MiB/step
    )(xcat, basis, melt)

    # Epilogue (tiny, fuses into one pass): global max over the VALID region
    # only, floor, scale, and pad_or_trim.  Padded frame rows / mel channels
    # never feed the max or the output.
    valid = out[:N_MELS, :T]                          # (80, T) un-floored log-mel
    gmax = jnp.max(valid)
    mel = (jnp.maximum(valid, gmax - 8.0) + 4.0) / 4.0
    if T >= N_FRAMES:                                 # pad_or_trim (F.pad semantics)
        return mel[:, :N_FRAMES]
    return jnp.pad(mel, ((0, 0), (0, N_FRAMES - T)))


class MelComputePallas:
    """JAX/Pallas equivalent of MelCompute.forward."""

    def __init__(self, mel_filter_np):
        # constants built once and kept on device (cached across calls)
        self.basis = _fused_basis_bf16()                       # (480, 512) bf16
        melt = np.zeros((F_PAD, M_PAD), np.float32)
        melt[:N_FREQ, :N_MELS] = mel_filter_np.T
        self.melt = jnp.asarray(melt, dtype=jnp.bfloat16)      # (256, 128) bf16

    def __call__(self, audio):
        content_frames = int(audio.shape[0]) // HOP_LENGTH
        mel_padded = _mel_forward(audio, self.basis, self.melt)
        return mel_padded, content_frames


# ---- reference (float64 numpy) for sanity checks ------------------------------
def _q_bf16(a):
    """Round float64 values through float32 -> bfloat16 (same path as the kernel)."""
    a32 = np.asarray(a, np.float32)
    return np.asarray(jnp.asarray(a32, dtype=jnp.bfloat16).astype(jnp.float32),
                      np.float64)


def _reference(audio_np, mel_f, quantize_dft=False):
    """Float64 reference.  With quantize_dft=True the DFT operands (frames and
    window-folded bases) are rounded to bfloat16 exactly like the kernel's MXU
    operands, isolating kernel-structure error from bf16 quantization error."""
    T = audio_np.shape[0] // HOP_LENGTH
    pad = N_FFT // 2
    x = np.pad(audio_np.astype(np.float64), (pad, pad), mode="reflect")
    idx = np.arange(T)[:, None] * HOP_LENGTH + np.arange(N_FFT)[None, :]
    frames = x[idx]                                   # (T, 400)
    bc, bs = _dft_basis_f64()                         # (400, 201) each
    if quantize_dft:
        frames, bc, bs = _q_bf16(frames), _q_bf16(bc), _q_bf16(bs)
    re = frames @ bc
    im = frames @ bs
    mags = re * re + im * im                          # (T, 201)
    mel = mel_f.astype(np.float64) @ mags.T           # (80, T)
    log_spec = np.log10(np.maximum(mel, 1e-10))
    log_spec = np.maximum(log_spec, log_spec.max() - 8.0)
    return (log_spec + 4.0) / 4.0


if __name__ == "__main__":
    key = jax.random.PRNGKey(0)
    L = 16000  # 1 second of 16 kHz audio (small example consistent with the module)
    audio = jax.random.normal(key, (L,), dtype=jnp.float32)

    mel_filter_np = _mel_filterbank()                 # deterministic (80, 201) weights
    model = MelComputePallas(mel_filter_np)

    mel_padded, content_frames = model(audio)
    mel_padded = jax.block_until_ready(mel_padded)

    assert mel_padded.shape == (N_MELS, N_FRAMES)
    assert mel_padded.dtype == jnp.float32
    assert content_frames == L // HOP_LENGTH

    audio_np = np.asarray(audio)
    got = np.asarray(mel_padded)[:, :content_frames]

    # (1) Strict structural check: reference uses the SAME bf16-rounded DFT
    #     operands but exact float64 math; any diff beyond f32 accumulation /
    #     mag-cast noise would indicate a kernel bug.
    ref_q = _reference(audio_np, mel_filter_np, quantize_dft=True)
    np.testing.assert_allclose(got, ref_q, atol=5e-3, rtol=0)

    # (2) End-to-end check vs the true float64 module semantics.  bf16 MXU
    #     operands make isolated near-null frequency bins noisier, so gate on
    #     the bulk error statistics rather than a single worst-case element.
    ref = _reference(audio_np, mel_filter_np, quantize_dft=False)
    err = np.abs(got - ref)
    assert float(err.mean()) < 2e-3
    assert float(np.percentile(err, 99.0)) < 2e-2

    # padded region must be exactly zero (F.pad semantics)
    assert np.all(np.asarray(mel_padded)[:, content_frames:] == 0.0)

    print("KERNEL_OK")
</pallas_src>

<mosaic_0001>
module attributes {stable_mosaic.version = 11 : i64} {
  func.func @_mel_kernel(%arg0: i32, %arg1: memref<128x480xbf16, #tpu.memory_space<vmem>>, %arg2: memref<480x512xbf16, #tpu.memory_space<vmem>>, %arg3: memref<256x128xbf16, #tpu.memory_space<vmem>>, %arg4: memref<128x128xf32, #tpu.memory_space<vmem>>) attributes {dimension_semantics = [#tpu.dimension_semantics<parallel>], iteration_bounds = array<i64: 1>, scalar_prefetch = 0 : i64, scratch_operands = 0 : i64, tpu.core_type = #tpu.core_type<tc>, window_params = [{transform_indices = @transform_0, window_bounds = array<i64: 128, 480>}, {pipeline_mode = #tpu.pipeline_mode<synchronous>, transform_indices = @transform_1, window_bounds = array<i64: 480, 512>}, {pipeline_mode = #tpu.pipeline_mode<synchronous>, transform_indices = @transform_2, window_bounds = array<i64: 256, 128>}, {transform_indices = @transform_3, window_bounds = array<i64: 128, 128>}]} {
    %c0 = arith.constant 0 : index
    %c0_0 = arith.constant 0 : index
    %0 = vector.load %arg1[%c0, %c0_0] : memref<128x480xbf16, #tpu.memory_space<vmem>>, vector<128x480xbf16>
    %c0_1 = arith.constant 0 : index
    %c0_2 = arith.constant 0 : index
    %1 = vector.load %arg2[%c0_1, %c0_2] : memref<480x512xbf16, #tpu.memory_space<vmem>>, vector<480x512xbf16>
    %cst = arith.constant dense<0.000000e+00> : vector<128x512xf32>
    %2 = tpu.matmul %0, %1, %cst {dimension_numbers = #tpu.dot_dimension_numbers<[1], [0], [0], [1], [0, 0, 1, 1], [], []>} : vector<128x480xbf16>, vector<480x512xbf16>, vector<128x512xf32> -> vector<128x512xf32>
    %3 = vector.extract_strided_slice %2 {offsets = [0, 0], sizes = [128, 256], strides = [1, 1]} : vector<128x512xf32> to vector<128x256xf32>
    %4 = vector.extract_strided_slice %2 {offsets = [0, 256], sizes = [128, 256], strides = [1, 1]} : vector<128x512xf32> to vector<128x256xf32>
    %5 = arith.mulf %3, %3 : vector<128x256xf32>
    %6 = arith.mulf %4, %4 : vector<128x256xf32>
    %7 = arith.addf %5, %6 : vector<128x256xf32>
    %8 = arith.truncf %7 : vector<128x256xf32> to vector<128x256xbf16>
    %c0_3 = arith.constant 0 : index
    %c0_4 = arith.constant 0 : index
    %9 = vector.load %arg3[%c0_3, %c0_4] : memref<256x128xbf16, #tpu.memory_space<vmem>>, vector<256x128xbf16>
    %cst_5 = arith.constant dense<0.000000e+00> : vector<128x128xf32>
    %10 = tpu.matmul %8, %9, %cst_5 {dimension_numbers = #tpu.dot_dimension_numbers<[1], [0], [0], [1], [0, 0, 1, 1], [], []>} : vector<128x256xbf16>, vector<256x128xbf16>, vector<128x128xf32> -> vector<128x128xf32>
    %cst_6 = arith.constant 1.000000e-10 : f32
    %11 = vector.broadcast %cst_6 : f32 to vector<128x128xf32>
    %12 = arith.maximumf %10, %11 : vector<128x128xf32>
    %13 = math.log %12 : vector<128x128xf32>
    %cst_7 = arith.constant 0.434294492 : f32
    %14 = vector.broadcast %cst_7 : f32 to vector<128x128xf32>
    %15 = arith.mulf %13, %14 : vector<128x128xf32>
    %16 = tpu.transpose %15, [1, 0] : vector<128x128xf32> -> vector<128x128xf32>
    %c0_8 = arith.constant 0 : index
    %c0_9 = arith.constant 0 : index
    %17 = vector.load %arg4[%c0_8, %c0_9] : memref<128x128xf32, #tpu.memory_space<vmem>>, vector<128x128xf32>
    tpu.vector_store %arg4[%c0_8, %c0_9], %16 {strides = array<i32>} : memref<128x128xf32, #tpu.memory_space<vmem>>, vector<128x128xf32>,
    return
  }
  func.func @transform_0(%arg0: i32) -> (i32, i32) {
    %c0_i32 = arith.constant 0 : i32
    %c0_i32_0 = arith.constant 0 : i32
    return %arg0, %c0_i32 : i32, i32
  }
  func.func @transform_1(%arg0: i32) -> (i32, i32) {
    %c0_i32 = arith.constant 0 : i32
    %c0_i32_0 = arith.constant 0 : i32
    %c0_i32_1 = arith.constant 0 : i32
    return %c0_i32, %c0_i32_0 : i32, i32
  }
  func.func @transform_2(%arg0: i32) -> (i32, i32) {
    %c0_i32 = arith.constant 0 : i32
    %c0_i32_0 = arith.constant 0 : i32
    %c0_i32_1 = arith.constant 0 : i32
    return %c0_i32, %c0_i32_0 : i32, i32
  }
  func.func @transform_3(%arg0: i32) -> (i32, i32) {
    %c0_i32 = arith.constant 0 : i32
    %c0_i32_0 = arith.constant 0 : i32
    return %c0_i32, %arg0 : i32, i32
  }
}

</mosaic_0001>

<bundles_post_ra>
// kernel: reverse.1
= control target key start
LH: loop header
LB: loop body
LE: loop exit
PB: predicated region body
PF: predicated region fallthrough
CT: control target
= control target key end

     0   :  { %v2_v0 = vlaneseq  ;;  %s150_s0 = inlined_call_operand.vmem [shape: bf16[256], index: 0, kind: input, shape index: {}]   ;;  %s151_s1 = inlined_call_operand.vmem [shape: bf16[256], index: 1, kind: output, shape index: {}]  }
   0x2   :  { %v3_v1 = vsub.s32 127, %v2_v0 }
   0x4   :  { %4 = vset.pattern.permute.xlu0 %v3_v1 }
   0x5   :  { %v64_v2 = vld [vmem:[#allocation1] sm:$0x1]  ;;  %v21_v3 = vld [vmem:[%s150_s0] sm:$0x1]  ;;  %v81_v12 = vshrl.u32 %v2_v0, 7  ;;  %v133_v15 = vmov 0.0  }
   0x6   :  { %v65_v4 = vunpack.c.l.bf16 %v64_v2  ;;  %22 = vst [vmem:[#allocation1 + $0x1] sm:$0x1] %v21_v3 }
   0x7   :  { %vm82_vm0 = vcmp.lt.s32.totalorder %v81_v12, 2 }
   0x8   :  { %67 = vst [vmem:[#allocation0] sm:$0x3] %v65_v4 }
   0xd   :  { %v50_v5 = vld [vmem:[#allocation1 + $0x1] sm:$0x1] }
   0xe   :  { %v51_v6 = vunpack.c.l.bf16 %v50_v5 }
   0xf   :  { %v69_v7 = vld [vmem:[#allocation0 + $0x7] ss:$-1 sm:$0xff] }
  0x10   :  { %v70_v8 = vrot.slane %v69_v7, 6  ;;  %54 = vst [vmem:[#allocation0 + $0x8] sm:$0x3] %v51_v6 }
  0x12   :  { %71 = vperm.xlu0 %4, %v70_v8  }
  0x17   :  { %v76_v9 = vld [vmem:[#allocation0 + $0xf] ss:$-1 sm:$0xff] }
  0x18   :  { %v77_v10 = vrot.slane %v76_v9, 6 }
  0x1a   :  { %78 = vperm.xlu0 %4, %v77_v10  }
  0x91   :  { %v72_v11 = vpop.permute.xlu0 %71 }
  0x92   :  { %73 = vst [vmem:[#allocation2] sm:$0xff] %v72_v11 }
  0x99   :  { %v79_v13 = vpop.permute.xlu0 %78 }
  0x9a   :  { %83 = vst.msk [vmem:[#allocation2] sm:$0xff] %vm82_vm0, %v79_v13 }
  0xa1   :  { %v88_v14 = vld [vmem:[#allocation2] sm:$0x3] }
  0xa2   :  { %v89_v16 = vpack.c.bf16 %v133_v15, %v88_v14 }
  0xa4   :  { %91 = vst [vmem:[#allocation3] sm:$0x1] %v89_v16 }
  0xab   :  { %v107_v17 = vld [vmem:[#allocation3] sm:$0x1] }
  0xac   :  { %108 = vst [vmem:[%s151_s1] sm:$0x1] %v107_v17 }

// kernel: _mel_forward.1
= control target key start
LH: loop header
LB: loop body
LE: loop exit
PB: predicated region body
PF: predicated region fallthrough
CT: control target
= control target key end

     0   :  { %vm919_vm0 = vcmask 785408   ;;  %s3041_s1 = inlined_call_operand.vmem [shape: bf16[480,512], index: 1, kind: input, shape index: {}]   ;;  %s3042_s0 = inlined_call_operand.vmem [shape: bf16[128,480], index: 0, kind: input, shape index: {}]   ;;  %s3043_s2 = inlined_call_operand.vmem [shape: bf16[256,128], index: 2, kind: input, shape index: {}]   ;;  %s3044_s3 = inlined_call_operand.vmem [shape: f32[128,128], index: 3, kind: output, shape index: {}]  }
   0x1   :  { %v2177_v0 = vld [vmem:[%s3041_s1 + $0x4] ss:$16 sps:$4 sm:$0xff]   ;;  %v2179_v1 = vld [vmem:[%s3041_s1 + $0xc] ss:$16 sps:$4 sm:$0xff]   ;;  %v2181_v2 = vld [vmem:[%s3041_s1] ss:$16 sps:$4 sm:$0xff]  }
   0x2   :  { %944 = vmatprep.subr.bf16.mxu0 %v2177_v0  ;;  %v2182_v3 = vld [vmem:[%s3041_s1 + $0x8] ss:$16 sps:$4 sm:$0xff]   ;;  %1170 = vmatprep.subr.bf16.mxu1 %v2179_v1  ;;  %v2183_v4 = vld [vmem:[%s3041_s1 + $0x24] ss:$16 sps:$4 sm:$0xff]   ;;  %v2185_v5 = vld [vmem:[%s3041_s1 + $0x2c] ss:$16 sps:$4 sm:$0xff]  }
   0x3   :  { %945 = vmatpush1.bf16.msra.mxu0 %v2181_v2  ;;  %1171 = vmatpush1.bf16.msra.mxu1 %v2182_v3  ;;  %v2187_v6 = vld [vmem:[%s3041_s1 + $0x20] ss:$16 sps:$4 sm:$0xff]   ;;  %v2188_v7 = vld [vmem:[%s3041_s1 + $0x28] ss:$16 sps:$4 sm:$0xff]   ;;  %v2189_v8 = vld [vmem:[%s3041_s1 + $0x44] ss:$16 sps:$4 sm:$0xff]  }
   0x4   :  { %946 = vmatprep.subr.bf16.mxu0 %v2183_v4  ;;  %1172 = vmatprep.subr.bf16.mxu1 %v2185_v5  ;;  %v2191_v9 = vld [vmem:[%s3041_s1 + $0x4c] ss:$16 sps:$4 sm:$0xff]   ;;  %v2193_v10 = vld [vmem:[%s3041_s1 + $0x40] ss:$16 sps:$4 sm:$0xff]   ;;  %v2194_v11 = vld [vmem:[%s3041_s1 + $0x48] ss:$16 sps:$4 sm:$0xff]  }
   0x5   :  { %v2195_v12 = vld [vmem:[%s3041_s1 + $0x64] ss:$16 sps:$4 sm:$0xff]   ;;  %v2197_v13 = vld [vmem:[%s3041_s1 + $0x6c] ss:$16 sps:$4 sm:$0xff]   ;;  %v2199_v14 = vld [vmem:[%s3041_s1 + $0x60] ss:$16 sps:$4 sm:$0xff]  }
   0x6   :  { %v2200_v15 = vld [vmem:[%s3041_s1 + $0x68] ss:$16 sps:$4 sm:$0xff]   ;;  %v2201_v16 = vld [vmem:[%s3041_s1 + $0x84] ss:$16 sps:$4 sm:$0xff]   ;;  %v2203_v17 = vld [vmem:[%s3041_s1 + $0x8c] ss:$16 sps:$4 sm:$0xff]  }
   0x7   :  { %947 = vmatpush1.bf16.msra.mxu0 %v2187_v6  ;;  %1173 = vmatpush1.bf16.msra.mxu1 %v2188_v7  ;;  %v2205_v18 = vld [vmem:[%s3041_s1 + $0x80] ss:$16 sps:$4 sm:$0xff]   ;;  %v2206_v19 = vld [vmem:[%s3041_s1 + $0x88] ss:$16 sps:$4 sm:$0xff]   ;;  %v2207_v20 = vld [vmem:[%s3041_s1 + $0xa4] ss:$16 sps:$4 sm:$0xff]  }
   0x8   :  { %948 = vmatprep.subr.bf16.mxu0 %v2189_v8  ;;  %1174 = vmatprep.subr.bf16.mxu1 %v2191_v9  ;;  %v2209_v21 = vld [vmem:[%s3041_s1 + $0xac] ss:$16 sps:$4 sm:$0xff]   ;;  %v2211_v22 = vld [vmem:[%s3041_s1 + $0xa0] ss:$16 sps:$4 sm:$0xff]   ;;  %v2212_v23 = vld [vmem:[%s3041_s1 + $0xa8] ss:$16 sps:$4 sm:$0xff]  }
   0x9   :  { %v2213_v24 = vld [vmem:[%s3041_s1 + $0xc4] ss:$16 sps:$4 sm:$0xff]   ;;  %v2215_v25 = vld [vmem:[%s3041_s1 + $0xcc] ss:$16 sps:$4 sm:$0xff]   ;;  %v2217_v26 = vld [vmem:[%s3041_s1 + $0xc0] ss:$16 sps:$4 sm:$0xff]  }
   0xa   :  { %v2218_v27 = vld [vmem:[%s3041_s1 + $0xc8] ss:$16 sps:$4 sm:$0xff]   ;;  %v2219_v28 = vld [vmem:[%s3041_s1 + $0xe4] ss:$16 sps:$4 sm:$0xff]   ;;  %v2221_v29 = vld [vmem:[%s3041_s1 + $0xec] ss:$16 sps:$4 sm:$0xff]  }
   0xb   :  { %949 = vmatpush1.bf16.msra.mxu0 %v2193_v10  ;;  %1175 = vmatpush1.bf16.msra.mxu1 %v2194_v11  ;;  %v2223_v30 = vld [vmem:[%s3041_s1 + $0xe0] ss:$16 sps:$4 sm:$0xff]   ;;  %v2224_v31 = vld [vmem:[%s3041_s1 + $0xe8] ss:$16 sps:$4 sm:$0xff]   ;;  %v2225_v32 = vld [vmem:[%s3041_s1 + $0x104] ss:$16 sps:$4 sm:$0xff]  }
   0xc   :  { %950 = vmatprep.subr.bf16.mxu0 %v2195_v12  ;;  %1176 = vmatprep.subr.bf16.mxu1 %v2197_v13  ;;  %v2227_v33 = vld [vmem:[%s3041_s1 + $0x10c] ss:$16 sps:$4 sm:$0xff]   ;;  %v2229_v34 = vld [vmem:[%s3041_s1 + $0x100] ss:$16 sps:$4 sm:$0xff]   ;;  %v2230_v35 = vld [vmem:[%s3041_s1 + $0x108] ss:$16 sps:$4 sm:$0xff]  }
   0xd   :  { %v2231_v36 = vld [vmem:[%s3041_s1 + $0x124] ss:$16 sps:$4 sm:$0xff]   ;;  %v2233_v37 = vld [vmem:[%s3041_s1 + $0x12c] ss:$16 sps:$4 sm:$0xff]   ;;  %v2235_v38 = vld [vmem:[%s3041_s1 + $0x120] ss:$16 sps:$4 sm:$0xff]  }
   0xe   :  { %v2236_v39 = vld [vmem:[%s3041_s1 + $0x128] ss:$16 sps:$4 sm:$0xff]   ;;  %v2237_v40 = vld [vmem:[%s3041_s1 + $0x144] ss:$16 sps:$4 sm:$0xff]   ;;  %v2239_v41 = vld [vmem:[%s3041_s1 + $0x14c] ss:$16 sps:$4 sm:$0xff]  }
   0xf   :  { %951 = vmatpush1.bf16.msra.mxu0 %v2199_v14  ;;  %1177 = vmatpush1.bf16.msra.mxu1 %v2200_v15  ;;  %v2241_v42 = vld [vmem:[%s3041_s1 + $0x140] ss:$16 sps:$4 sm:$0xff]   ;;  %v2242_v43 = vld [vmem:[%s3041_s1 + $0x148] ss:$16 sps:$4 sm:$0xff]   ;;  %v2243_v44 = vld [vmem:[%s3041_s1 + $0x164] ss:$16 sps:$4 sm:$0xff]  }
  0x10   :  { %952 = vmatprep.subr.bf16.mxu0 %v2201_v16  ;;  %1178 = vmatprep.subr.bf16.mxu1 %v2203_v17  ;;  %v2245_v45 = vld [vmem:[%s3041_s1 + $0x16c] ss:$16 sps:$4 sm:$0xff]   ;;  %v2247_v46 = vld [vmem:[%s3041_s1 + $0x160] ss:$16 sps:$4 sm:$0xff]   ;;  %v2248_v47 = vld [vmem:[%s3041_s1 + $0x168] ss:$16 sps:$4 sm:$0xff]  }
  0x11   :  { %v2275_v48 = vld [vmem:[%s3042_s0 + $0x4] ss:$16 sps:$4 sm:$0xff]   ;;  %v2251_v50 = vld [vmem:[%s3041_s1 + $0x18c] ss:$16 sps:$4 sm:$0xff]   ;;  %v2253_v51 = vld [vmem:[%s3041_s1 + $0x180] ss:$16 sps:$4 sm:$0xff]  }
  0x12   :  { %v2249_v49 = vld [vmem:[%s3041_s1 + $0x184] ss:$16 sps:$4 sm:$0xff]   ;;  %976 = vmatprep.mubr.bf16.mxu0 %v2275_v48  ;;  %1202 = vmatprep.mubr.bf16.mxu1 %v2275_v48  ;;  %v2254_v52 = vld [vmem:[%s3041_s1 + $0x188] ss:$16 sps:$4 sm:$0xff]   ;;  %v2257_v54 = vld [vmem:[%s3041_s1 + $0x1ac] ss:$16 sps:$4 sm:$0xff]  }
  0x13   :  { %953 = vmatpush1.bf16.msra.mxu0 %v2205_v18  ;;  %1179 = vmatpush1.bf16.msra.mxu1 %v2206_v19  ;;  %v2255_v53 = vld [vmem:[%s3041_s1 + $0x1a4] ss:$16 sps:$4 sm:$0xff]   ;;  %v2259_v55 = vld [vmem:[%s3041_s1 + $0x1a0] ss:$16 sps:$4 sm:$0xff]   ;;  %v2260_v56 = vld [vmem:[%s3041_s1 + $0x1a8] ss:$16 sps:$4 sm:$0xff]  }
  0x14   :  { %954 = vmatprep.subr.bf16.mxu0 %v2207_v20  ;;  %1180 = vmatprep.subr.bf16.mxu1 %v2209_v21  ;;  %v2261_v57 = vld [vmem:[%s3041_s1 + $0x1c4] ss:$16 sps:$4 sm:$0xff]   ;;  %v2263_v58 = vld [vmem:[%s3041_s1 + $0x1cc] ss:$16 sps:$4 sm:$0xff]   ;;  %v2265_v59 = vld [vmem:[%s3041_s1 + $0x1c0] ss:$16 sps:$4 sm:$0xff]  }
  0x15   :  { %v2266_v60 = vld [vmem:[%s3041_s1 + $0x1c8] ss:$16 sps:$4 sm:$0xff]   ;;  %v2267_v61 = vld [vmem:[%s3041_s1 + $0x1e4] ss:$16 sps:$4 sm:$0xff]   ;;  %v2269_v62 = vld [vmem:[%s3041_s1 + $0x1ec] ss:$16 sps:$4 sm:$0xff]  }
  0x16   :  { %v2271_v63 = vld [vmem:[%s3041_s1 + $0x1e0] ss:$16 sps:$4 sm:$0xff]   ;;  %v2272_v0 = vld [vmem:[%s3041_s1 + $0x1e8] ss:$16 sps:$4 sm:$0xff]   ;;  %v2278_v1 = vld [vmem:[%s3041_s1 + $0x204] ss:$16 sps:$4 sm:$0xff]  }
  0x17   :  { %955 = vmatpush1.bf16.msra.mxu0 %v2211_v22  ;;  %1181 = vmatpush1.bf16.msra.mxu1 %v2212_v23  ;;  %v2281_v2 = vld [vmem:[%s3041_s1 + $0x20c] ss:$16 sps:$4 sm:$0xff]   ;;  %v2273_v3 = vld [vmem:[%s3042_s0] ss:$16 sps:$4 sm:$0xff]   ;;  %v2279_v5 = vld [vmem:[%s3041_s1 + $0x208] ss:$16 sps:$4 sm:$0xff]  }
  0x18   :  { %956 = vmatprep.subr.bf16.mxu0 %v2213_v24  ;;  %1182 = vmatprep.subr.bf16.mxu1 %v2215_v25  ;;  %v2276_v4 = vld [vmem:[%s3041_s1 + $0x200] ss:$16 sps:$4 sm:$0xff]   ;;  %v2284_v6 = vld [vmem:[%s3041_s1 + $0x224] ss:$16 sps:$4 sm:$0xff]   ;;  %v2287_v7 = vld [vmem:[%s3041_s1 + $0x22c] ss:$16 sps:$4 sm:$0xff]  }
  0x19   :  { %v2288_v8 = vld [vmem:[%s3042_s0 + $0x24] ss:$16 sps:$4 sm:$0xff]   ;;  %v2282_v9 = vld [vmem:[%s3041_s1 + $0x220] ss:$16 sps:$4 sm:$0xff]   ;;  %v2285_v10 = vld [vmem:[%s3041_s1 + $0x228] ss:$16 sps:$4 sm:$0xff]  }
  0x1a   :  { %v2293_v11 = vld [vmem:[%s3041_s1 + $0x244] ss:$16 sps:$4 sm:$0xff]   ;;  %v2296_v12 = vld [vmem:[%s3041_s1 + $0x24c] ss:$16 sps:$4 sm:$0xff]   ;;  %v2290_v13 = vld [vmem:[%s3042_s0 + $0x20] ss:$16 sps:$4 sm:$0xff]  }
  0x1b   :  { %957 = vmatpush1.bf16.msra.mxu0 %v2217_v26  ;;  %1183 = vmatpush1.bf16.msra.mxu1 %v2218_v27  ;;  %v2291_v14 = vld [vmem:[%s3041_s1 + $0x240] ss:$16 sps:$4 sm:$0xff]   ;;  %v2294_v15 = vld [vmem:[%s3041_s1 + $0x248] ss:$16 sps:$4 sm:$0xff]   ;;  %v2299_v16 = vld [vmem:[%s3041_s1 + $0x264] ss:$16 sps:$4 sm:$0xff]  }
  0x1c   :  { %958 = vmatprep.subr.bf16.mxu0 %v2219_v28  ;;  %1184 = vmatprep.subr.bf16.mxu1 %v2221_v29  ;;  %v2302_v17 = vld [vmem:[%s3041_s1 + $0x26c] ss:$16 sps:$4 sm:$0xff]   ;;  %v2303_v18 = vld [vmem:[%s3042_s0 + $0x44] ss:$16 sps:$4 sm:$0xff]   ;;  %v2297_v19 = vld [vmem:[%s3041_s1 + $0x260] ss:$16 sps:$4 sm:$0xff]  }
  0x1d   :  { %v2300_v20 = vld [vmem:[%s3041_s1 + $0x268] ss:$16 sps:$4 sm:$0xff]   ;;  %v2308_v21 = vld [vmem:[%s3041_s1 + $0x284] ss:$16 sps:$4 sm:$0xff]   ;;  %v2311_v22 = vld [vmem:[%s3041_s1 + $0x28c] ss:$16 sps:$4 sm:$0xff]  }
  0x1e   :  { %v2305_v23 = vld [vmem:[%s3042_s0 + $0x40] ss:$16 sps:$4 sm:$0xff]   ;;  %v2309_v25 = vld [vmem:[%s3041_s1 + $0x288] ss:$16 sps:$4 sm:$0xff]   ;;  %v2312_v26 = vld [vmem:[%s3042_s0 + $0x64] ss:$16 sps:$4 sm:$0xff]  }
  0x1f   :  { %959 = vmatpush1.bf16.msra.mxu0 %v2223_v30  ;;  %1185 = vmatpush1.bf16.msra.mxu1 %v2224_v31  ;;  %v2306_v24 = vld [vmem:[%s3041_s1 + $0x280] ss:$16 sps:$4 sm:$0xff]   ;;  %v2316_v27 = vld [vmem:[%s3041_s1 + $0x2a4] ss:$16 sps:$4 sm:$0xff]   ;;  %v2319_v28 = vld [vmem:[%s3041_s1 + $0x2ac] ss:$16 sps:$4 sm:$0xff]  }
  0x20   :  { %960 = vmatprep.subr.bf16.mxu0 %v2225_v32  ;;  %1186 = vmatprep.subr.bf16.mxu1 %v2227_v33  ;;  %v2314_v29 = vld [vmem:[%s3041_s1 + $0x2a0] ss:$16 sps:$4 sm:$0xff]   ;;  %v2317_v30 = vld [vmem:[%s3041_s1 + $0x2a8] ss:$16 sps:$4 sm:$0xff]   ;;  %v2323_v31 = vld [vmem:[%s3041_s1 + $0x2c4] ss:$16 sps:$4 sm:$0xff]  }
  0x21   :  { %v2326_v32 = vld [vmem:[%s3041_s1 + $0x2cc] ss:$16 sps:$4 sm:$0xff]   ;;  %v2320_v33 = vld [vmem:[%s3042_s0 + $0x60] ss:$16 sps:$4 sm:$0xff]  }
  0x22   :  { %v2350_v48 = vld [vmem:[%s3041_s1 + $0x32c] ss:$16 sps:$4 sm:$0xff]  }
  0x23   :  { %961 = vmatpush1.bf16.msra.mxu0 %v2229_v34  ;;  %1187 = vmatpush1.bf16.msra.mxu1 %v2230_v35  ;;  %v2321_v34 = vld [vmem:[%s3041_s1 + $0x2c0] ss:$16 sps:$4 sm:$0xff]   ;;  %v2324_v35 = vld [vmem:[%s3041_s1 + $0x2c8] ss:$16 sps:$4 sm:$0xff]  }
  0x24   :  { %962 = vmatprep.subr.bf16.mxu0 %v2231_v36  ;;  %1188 = vmatprep.subr.bf16.mxu1 %v2233_v37  ;;  %v2327_v36 = vld [vmem:[%s3042_s0 + $0x84] ss:$16 sps:$4 sm:$0xff]  }
  0x25   :  { %v2332_v37 = vld [vmem:[%s3041_s1 + $0x2e4] ss:$16 sps:$4 sm:$0xff]  }
  0x27   :  { %963 = vmatpush1.bf16.msra.mxu0 %v2235_v38  ;;  %1189 = vmatpush1.bf16.msra.mxu1 %v2236_v39  ;;  %v2335_v38 = vld [vmem:[%s3041_s1 + $0x2ec] ss:$16 sps:$4 sm:$0xff]   ;;  %v2330_v39 = vld [vmem:[%s3041_s1 + $0x2e0] ss:$16 sps:$4 sm:$0xff]  }
  0x28   :  { %964 = vmatprep.subr.bf16.mxu0 %v2237_v40  ;;  %1190 = vmatprep.subr.bf16.mxu1 %v2239_v41  ;;  %v2333_v40 = vld [vmem:[%s3041_s1 + $0x2e8] ss:$16 sps:$4 sm:$0xff]   ;;  %v2338_v41 = vld [vmem:[%s3041_s1 + $0x304] ss:$16 sps:$4 sm:$0xff]  }
  0x2b   :  { %965 = vmatpush1.bf16.msra.mxu0 %v2241_v42  ;;  %1191 = vmatpush1.bf16.msra.mxu1 %v2242_v43  ;;  %v2341_v42 = vld [vmem:[%s3041_s1 + $0x30c] ss:$16 sps:$4 sm:$0xff]   ;;  %v2329_v43 = vld [vmem:[%s3042_s0 + $0x80] ss:$16 sps:$4 sm:$0xff]  }
  0x2c   :  { %966 = vmatprep.subr.bf16.mxu0 %v2243_v44  ;;  %1192 = vmatprep.subr.bf16.mxu1 %v2245_v45  ;;  %v2336_v44 = vld [vmem:[%s3041_s1 + $0x300] ss:$16 sps:$4 sm:$0xff]   ;;  %v2339_v45 = vld [vmem:[%s3041_s1 + $0x308] ss:$16 sps:$4 sm:$0xff]  }
  0x2f   :  { %967 = vmatpush1.bf16.msra.mxu0 %v2247_v46  ;;  %1193 = vmatpush1.bf16.msra.mxu1 %v2248_v47  ;;  %v2342_v46 = vld [vmem:[%s3042_s0 + $0xa4] ss:$16 sps:$4 sm:$0xff]  }
  0x30   :  { %968 = vmatprep.subr.bf16.mxu0 %v2249_v49  ;;  %1194 = vmatprep.subr.bf16.mxu1 %v2251_v50  ;;  %v2347_v47 = vld [vmem:[%s3041_s1 + $0x324] ss:$16 sps:$4 sm:$0xff]   ;;  %v2345_v49 = vld [vmem:[%s3041_s1 + $0x320] ss:$16 sps:$4 sm:$0xff]   ;;  %v2348_v50 = vld [vmem:[%s3041_s1 + $0x328] ss:$16 sps:$4 sm:$0xff]  }
  0x33   :  { %969 = vmatpush1.bf16.msra.mxu0 %v2253_v51  ;;  %1195 = vmatpush1.bf16.msra.mxu1 %v2254_v52  ;;  %v2353_v51 = vld [vmem:[%s3041_s1 + $0x344] ss:$16 sps:$4 sm:$0xff]   ;;  %v2344_v52 = vld [vmem:[%s3042_s0 + $0xa0] ss:$16 sps:$4 sm:$0xff]  }
  0x34   :  { %970 = vmatprep.subr.bf16.mxu0 %v2255_v53  ;;  %1196 = vmatprep.subr.bf16.mxu1 %v2257_v54  ;;  %v2356_v53 = vld [vmem:[%s3041_s1 + $0x34c] ss:$16 sps:$4 sm:$0xff]   ;;  %v2351_v54 = vld [vmem:[%s3041_s1 + $0x340] ss:$16 sps:$4 sm:$0xff]  }
  0x37   :  { %971 = vmatpush1.bf16.msra.mxu0 %v2259_v55  ;;  %1197 = vmatpush1.bf16.msra.mxu1 %v2260_v56  ;;  %v2354_v55 = vld [vmem:[%s3041_s1 + $0x348] ss:$16 sps:$4 sm:$0xff]   ;;  %v2357_v56 = vld [vmem:[%s3042_s0 + $0xc4] ss:$16 sps:$4 sm:$0xff]  }
  0x38   :  { %972 = vmatprep.subr.bf16.mxu0 %v2261_v57  ;;  %1198 = vmatprep.subr.bf16.mxu1 %v2263_v58  ;;  %v2362_v57 = vld [vmem:[%s3041_s1 + $0x364] ss:$16 sps:$4 sm:$0xff]   ;;  %v2365_v58 = vld [vmem:[%s3041_s1 + $0x36c] ss:$16 sps:$4 sm:$0xff]  }
  0x3b   :  { %973 = vmatpush1.bf16.msra.mxu0 %v2265_v59  ;;  %1199 = vmatpush1.bf16.msra.mxu1 %v2266_v60  ;;  %v2360_v59 = vld [vmem:[%s3041_s1 + $0x360] ss:$16 sps:$4 sm:$0xff]   ;;  %v2363_v60 = vld [vmem:[%s3041_s1 + $0x368] ss:$16 sps:$4 sm:$0xff]  }
  0x3c   :  { %974 = vmatprep.subr.bf16.mxu0 %v2267_v61  ;;  %1200 = vmatprep.subr.bf16.mxu1 %v2269_v62  ;;  %v2359_v61 = vld [vmem:[%s3042_s0 + $0xc0] ss:$16 sps:$4 sm:$0xff]   ;;  %v2370_v62 = vld [vmem:[%s3041_s1 + $0x384] ss:$16 sps:$4 sm:$0xff]  }
  0x3f   :  { %975 = vmatpush1.bf16.msra.mxu0 %v2271_v63  ;;  %1201 = vmatpush1.bf16.msra.mxu1 %v2272_v0  ;;  %v2366_v63 = vld [vmem:[%s3042_s0 + $0xe4] ss:$16 sps:$4 sm:$0xff]   ;;  %v2373_v0 = vld [vmem:[%s3041_s1 + $0x38c] ss:$16 sps:$4 sm:$0xff]  }
  0x40   :  { %1057 = vmatprep.subr.bf16.mxu0 %v2278_v1  ;;  %1283 = vmatprep.subr.bf16.mxu1 %v2281_v2  ;;  %v2368_v1 = vld [vmem:[%s3041_s1 + $0x380] ss:$16 sps:$4 sm:$0xff]   ;;  %v2371_v2 = vld [vmem:[%s3041_s1 + $0x388] ss:$16 sps:$4 sm:$0xff]  }
  0x42   :  { %977 = vmatmul.mubr.bf16.vlgmr.msra.gmra.mrb[0].mxu0 %v2273_v3  ;;  %1203 = vmatmul.mubr.bf16.vlgmr.msra.gmra.mrb[0].mxu1 %v2273_v3  ;;  %v2377_v3 = vld [vmem:[%s3041_s1 + $0x3a4] ss:$16 sps:$4 sm:$0xff]  }
  0x43   :  { %1058 = vmatpush1.bf16.msra.mxu0 %v2276_v4  ;;  %1284 = vmatpush1.bf16.msra.mxu1 %v2279_v5  ;;  %v2380_v4 = vld [vmem:[%s3041_s1 + $0x3ac] ss:$16 sps:$4 sm:$0xff]   ;;  %v2375_v5 = vld [vmem:[%s3041_s1 + $0x3a0] ss:$16 sps:$4 sm:$0xff]  }
  0x44   :  { %1059 = vmatprep.subr.bf16.mxu0 %v2284_v6  ;;  %1285 = vmatprep.subr.bf16.mxu1 %v2287_v7  ;;  %v2378_v6 = vld [vmem:[%s3041_s1 + $0x3a8] ss:$16 sps:$4 sm:$0xff]   ;;  %v2405_v7 = vld [vmem:[%s3043_s2 + $0x40] sm:$0xff]  }
  0x45   :  { %986 = vmatprep.mubr.bf16.mxu0 %v2288_v8  ;;  %1212 = vmatprep.mubr.bf16.mxu1 %v2288_v8  ;;  %v2374_v8 = vld [vmem:[%s3042_s0 + $0xe0] ss:$16 sps:$4 sm:$0xff]  }
  0x47   :  { %1060 = vmatpush1.bf16.msra.mxu0 %v2282_v9  ;;  %1286 = vmatpush1.bf16.msra.mxu1 %v2285_v10  ;;  %v2383_v9 = vld [vmem:[%s3042_s0 + $0xc] ss:$16 sps:$4 sm:$0xff]   ;;  %v2381_v10 = vld [vmem:[%s3042_s0 + $0x8] ss:$16 sps:$4 sm:$0xff]  }
  0x48   :  { %1061 = vmatprep.subr.bf16.mxu0 %v2293_v11  ;;  %1287 = vmatprep.subr.bf16.mxu1 %v2296_v12  ;;  %v2384_v11 = vld [vmem:[%s3042_s0 + $0x2c] ss:$16 sps:$4 sm:$0xff]   ;;  %v2406_v12 = vld [vmem:[%s3043_s2] sm:$0xff]  }
  0x4a   :  { %987 = vmatmul.mubr.bf16.gmra.mrb[4].mxu0 %v2290_v13  ;;  %1213 = vmatmul.mubr.bf16.gmra.mrb[4].mxu1 %v2290_v13  ;;  %v2407_v13 = vld [vmem:[%s3043_s2 + $0x48] sm:$0xff]  }
  0x4b   :  { %1062 = vmatpush1.bf16.msra.mxu0 %v2291_v14  ;;  %1288 = vmatpush1.bf16.msra.mxu1 %v2294_v15  ;;  %v2408_v14 = vld [vmem:[%s3043_s2 + $0x8] sm:$0xff]   ;;  %v2409_v15 = vld [vmem:[%s3043_s2 + $0x50] sm:$0xff]  }
  0x4c   :  { %1063 = vmatprep.subr.bf16.mxu0 %v2299_v16  ;;  %1289 = vmatprep.subr.bf16.mxu1 %v2302_v17  ;;  %v2386_v16 = vld [vmem:[%s3042_s0 + $0x28] ss:$16 sps:$4 sm:$0xff]   ;;  %v2387_v17 = vld [vmem:[%s3042_s0 + $0x4c] ss:$16 sps:$4 sm:$0xff]  }
  0x4d   :  { %996 = vmatprep.mubr.bf16.mxu0 %v2303_v18  ;;  %1222 = vmatprep.mubr.bf16.mxu1 %v2303_v18  ;;  %v2410_v18 = vld [vmem:[%s3043_s2 + $0x10] sm:$0xff]  }
  0x4f   :  { %1064 = vmatpush1.bf16.msra.mxu0 %v2297_v19  ;;  %1290 = vmatpush1.bf16.msra.mxu1 %v2300_v20  ;;  %v2411_v19 = vld [vmem:[%s3043_s2 + $0x58] sm:$0xff]  }
  0x50   :  { %1065 = vmatprep.subr.bf16.mxu0 %v2308_v21  ;;  %1291 = vmatprep.subr.bf16.mxu1 %v2311_v22  ;;  %v2412_v20 = vld [vmem:[%s3043_s2 + $0x18] sm:$0xff]   ;;  %v2413_v21 = vld [vmem:[%s3043_s2 + $0x60] sm:$0xff]  }
  0x51   :  { %v2389_v22 = vld [vmem:[%s3042_s0 + $0x48] ss:$16 sps:$4 sm:$0xff]  }
  0x52   :  { %997 = vmatmul.mubr.bf16.gmra.mrb[8].mxu0 %v2305_v23  ;;  %1223 = vmatmul.mubr.bf16.gmra.mrb[8].mxu1 %v2305_v23  ;;  %v2390_v23 = vld [vmem:[%s3042_s0 + $0x6c] ss:$16 sps:$4 sm:$0xff]  }
  0x53   :  { %1066 = vmatpush1.bf16.msra.mxu0 %v2306_v24  ;;  %1292 = vmatpush1.bf16.msra.mxu1 %v2309_v25  ;;  %v2414_v24 = vld [vmem:[%s3043_s2 + $0x20] sm:$0xff]   ;;  %v2415_v25 = vld [vmem:[%s3043_s2 + $0x68] sm:$0xff]  }
  0x54   :  { %1006 = vmatprep.mubr.bf16.mxu0 %v2312_v26  ;;  %1067 = vmatprep.subr.bf16.mxu0 %v2316_v27  ;;  %v2417_v27 = vld [vmem:[%s3043_s2 + $0x70] sm:$0xff]  }
  0x55   :  { %1232 = vmatprep.mubr.bf16.mxu1 %v2312_v26  ;;  %1293 = vmatprep.subr.bf16.mxu1 %v2319_v28  ;;  %v2416_v26 = vld [vmem:[%s3043_s2 + $0x28] sm:$0xff]  }
  0x56   :  { %v2392_v28 = vld [vmem:[%s3042_s0 + $0x68] ss:$16 sps:$4 sm:$0xff]  }
  0x57   :  { %1068 = vmatpush1.bf16.msra.mxu0 %v2314_v29  ;;  %1294 = vmatpush1.bf16.msra.mxu1 %v2317_v30  ;;  %v2393_v29 = vld [vmem:[%s3042_s0 + $0x8c] ss:$16 sps:$4 sm:$0xff]   ;;  %v2418_v30 = vld [vmem:[%s3043_s2 + $0x30] sm:$0xff]  }
  0x58   :  { %1069 = vmatprep.subr.bf16.mxu0 %v2323_v31  ;;  %1295 = vmatprep.subr.bf16.mxu1 %v2326_v32  ;;  %v2395_v31 = vld [vmem:[%s3042_s0 + $0x88] ss:$16 sps:$4 sm:$0xff]   ;;  %v2396_v32 = vld [vmem:[%s3042_s0 + $0xac] ss:$16 sps:$4 sm:$0xff]  }
  0x5a   :  { %1007 = vmatmul.mubr.bf16.gmra.mrb[12].mxu0 %v2320_v33  ;;  %1233 = vmatmul.mubr.bf16.gmra.mrb[12].mxu1 %v2320_v33  ;;  %v2398_v33 = vld [vmem:[%s3042_s0 + $0xa8] ss:$16 sps:$4 sm:$0xff]  }
  0x5b   :  { %1070 = vmatpush1.bf16.msra.mxu0 %v2321_v34  ;;  %1296 = vmatpush1.bf16.msra.mxu1 %v2324_v35  ;;  %v2399_v34 = vld [vmem:[%s3042_s0 + $0xcc] ss:$16 sps:$4 sm:$0xff]   ;;  %v2401_v35 = vld [vmem:[%s3042_s0 + $0xc8] ss:$16 sps:$4 sm:$0xff]  }
  0x5c   :  { %1016 = vmatprep.mubr.bf16.mxu0 %v2327_v36  ;;  %1242 = vmatprep.mubr.bf16.mxu1 %v2327_v36  ;;  %v2402_v36 = vld [vmem:[%s3042_s0 + $0xec] ss:$16 sps:$4 sm:$0xff]  }
  0x5d   :  { %1071 = vmatprep.subr.bf16.mxu0 %v2332_v37  ;;  %1297 = vmatprep.subr.bf16.mxu1 %v2335_v38  ;;  %v2404_v37 = vld [vmem:[%s3042_s0 + $0xe8] ss:$16 sps:$4 sm:$0xff]  }
  0x5e   :  { %v2419_v38 = vld [vmem:[%s3043_s2 + $0x78] sm:$0xff]  }
  0x5f   :  { %1072 = vmatpush1.bf16.msra.mxu0 %v2330_v39  ;;  %1298 = vmatpush1.bf16.msra.mxu1 %v2333_v40  ;;  %v2420_v39 = vld [vmem:[%s3043_s2 + $0x38] sm:$0xff]  }
  0x60   :  { %1073 = vmatprep.subr.bf16.mxu0 %v2338_v41  ;;  %1299 = vmatprep.subr.bf16.mxu1 %v2341_v42 }
  0x62   :  { %1017 = vmatmul.mubr.bf16.gmra.mrb[16].mxu0 %v2329_v43  ;;  %1243 = vmatmul.mubr.bf16.gmra.mrb[16].mxu1 %v2329_v43 }
  0x63   :  { %1074 = vmatpush1.bf16.msra.mxu0 %v2336_v44  ;;  %1300 = vmatpush1.bf16.msra.mxu1 %v2339_v45 }
  0x64   :  { %1026 = vmatprep.mubr.bf16.mxu0 %v2342_v46  ;;  %1252 = vmatprep.mubr.bf16.mxu1 %v2342_v46 }
  0x65   :  { %1075 = vmatprep.subr.bf16.mxu0 %v2347_v47  ;;  %1301 = vmatprep.subr.bf16.mxu1 %v2350_v48 }
  0x67   :  { %1076 = vmatpush1.bf16.msra.mxu0 %v2345_v49  ;;  %1302 = vmatpush1.bf16.msra.mxu1 %v2348_v50 }
  0x68   :  { %1077 = vmatprep.subr.bf16.mxu0 %v2353_v51  ;;  %1303 = vmatprep.subr.bf16.mxu1 %v2356_v53 }
  0x6a   :  { %1027 = vmatmul.mubr.bf16.gmra.mrb[20].mxu0 %v2344_v52  ;;  %1253 = vmatmul.mubr.bf16.gmra.mrb[20].mxu1 %v2344_v52 }
  0x6b   :  { %1036 = vmatprep.mubr.bf16.mxu0 %v2357_v56  ;;  %1078 = vmatpush1.bf16.msra.mxu0 %v2351_v54 }
  0x6c   :  { %1262 = vmatprep.mubr.bf16.mxu1 %v2357_v56  ;;  %1304 = vmatpush1.bf16.msra.mxu1 %v2354_v55 }
  0x6d   :  { %1079 = vmatprep.subr.bf16.mxu0 %v2362_v57  ;;  %1305 = vmatprep.subr.bf16.mxu1 %v2365_v58 }
  0x6f   :  { %1080 = vmatpush1.bf16.msra.mxu0 %v2360_v59 }
  0x70   :  { %1306 = vmatpush1.bf16.msra.mxu1 %v2363_v60  ;;  %1081 = vmatprep.subr.bf16.mxu0 %v2370_v62 }
  0x71   :  { %1307 = vmatprep.subr.bf16.mxu1 %v2373_v0 }
  0x72   :  { %1037 = vmatmul.mubr.bf16.gmra.mrb[24].mxu0 %v2359_v61  ;;  %1263 = vmatmul.mubr.bf16.gmra.mrb[24].mxu1 %v2359_v61 }
  0x73   :  { %1046 = vmatprep.mubr.bf16.mxu0 %v2366_v63  ;;  %1272 = vmatprep.mubr.bf16.mxu1 %v2366_v63 }
  0x74   :  { %1082 = vmatpush1.bf16.msra.mxu0 %v2368_v1  ;;  %1308 = vmatpush1.bf16.msra.mxu1 %v2371_v2 }
  0x75   :  { %1083 = vmatprep.subr.bf16.mxu0 %v2377_v3  ;;  %1309 = vmatprep.subr.bf16.mxu1 %v2380_v4 }
  0x78   :  { %1084 = vmatpush1.bf16.msra.mxu0 %v2375_v5  ;;  %1310 = vmatpush1.bf16.msra.mxu1 %v2378_v6 }
  0x79   :  { %2033 = vmatprep.subr.bf16.mxu0 %v2405_v7  ;;  %2097 = vmatprep.subr.bf16.mxu1 %v2405_v7 }
  0x7a   :  { %1047 = vmatmul.mubr.bf16.gmra.mrb[28].mxu0 %v2374_v8  ;;  %1273 = vmatmul.mubr.bf16.gmra.mrb[28].mxu1 %v2374_v8 }
  0x7b   :  { %2001 = vmatprep.mubr.msk.bf16.mxu0 %vm919_vm0, %v2383_v9  ;;  %2009 = vmatprep.mubr.msk.bf16.mxu1 %vm919_vm0, %v2383_v9 }
  0x82   :  { %1090 = vmatmul.mubr.bf16.vlgmr.msra.gmra.mrb[0].mxu0 %v2381_v10  ;;  %1316 = vmatmul.mubr.bf16.vlgmr.msra.gmra.mrb[0].mxu1 %v2381_v10 }
  0x83   :  { %2002 = vmatprep.mubr.msk.bf16.mxu0 %vm919_vm0, %v2384_v11  ;;  %2010 = vmatprep.mubr.msk.bf16.mxu1 %vm919_vm0, %v2384_v11 }
  0x84   :  { %2034 = vmatpush3.bf16.msra.mxu0 %v2406_v12  ;;  %2105 = vmatpush3.bf16.msra.mxu1 %v2406_v12 }
  0x85   :  { %2035 = vmatprep.subr.bf16.mxu0 %v2407_v13  ;;  %2098 = vmatprep.subr.bf16.mxu1 %v2407_v13 }
  0x88   :  { %2036 = vmatpush3.bf16.msra.mxu0 %v2408_v14  ;;  %2106 = vmatpush3.bf16.msra.mxu1 %v2408_v14 }
  0x89   :  { %2037 = vmatprep.subr.bf16.mxu0 %v2409_v15  ;;  %2099 = vmatprep.subr.bf16.mxu1 %v2409_v15 }
  0x8a   :  { %1100 = vmatmul.mubr.bf16.gmra.mrb[4].mxu0 %v2386_v16  ;;  %1326 = vmatmul.mubr.bf16.gmra.mrb[4].mxu1 %v2386_v16 }
  0x8b   :  { %2003 = vmatprep.mubr.msk.bf16.mxu0 %vm919_vm0, %v2387_v17  ;;  %2011 = vmatprep.mubr.msk.bf16.mxu1 %vm919_vm0, %v2387_v17 }
  0x8c   :  { %2038 = vmatpush3.bf16.msra.mxu0 %v2410_v18  ;;  %2107 = vmatpush3.bf16.msra.mxu1 %v2410_v18 }
  0x8d   :  { %2039 = vmatprep.subr.bf16.mxu0 %v2411_v19  ;;  %2100 = vmatprep.subr.bf16.mxu1 %v2411_v19 }
  0x90   :  { %2040 = vmatpush3.bf16.msra.mxu0 %v2412_v20  ;;  %2108 = vmatpush3.bf16.msra.mxu1 %v2412_v20 }
  0x91   :  { %2041 = vmatprep.subr.bf16.mxu0 %v2413_v21  ;;  %2101 = vmatprep.subr.bf16.mxu1 %v2413_v21 }
  0x92   :  { %1110 = vmatmul.mubr.bf16.gmra.mrb[8].mxu0 %v2389_v22  ;;  %1336 = vmatmul.mubr.bf16.gmra.mrb[8].mxu1 %v2389_v22 }
  0x93   :  { %2004 = vmatprep.mubr.msk.bf16.mxu0 %vm919_vm0, %v2390_v23  ;;  %2012 = vmatprep.mubr.msk.bf16.mxu1 %vm919_vm0, %v2390_v23 }
  0x94   :  { %2042 = vmatpush3.bf16.msra.mxu0 %v2414_v24  ;;  %2109 = vmatpush3.bf16.msra.mxu1 %v2414_v24 }
  0x95   :  { %2043 = vmatprep.subr.bf16.mxu0 %v2415_v25  ;;  %2102 = vmatprep.subr.bf16.mxu1 %v2415_v25 }
  0x98   :  { %2044 = vmatpush3.bf16.msra.mxu0 %v2416_v26  ;;  %2110 = vmatpush3.bf16.msra.mxu1 %v2416_v26 }
  0x99   :  { %2045 = vmatprep.subr.bf16.mxu0 %v2417_v27  ;;  %2103 = vmatprep.subr.bf16.mxu1 %v2417_v27 }
  0x9a   :  { %1120 = vmatmul.mubr.bf16.gmra.mrb[12].mxu0 %v2392_v28  ;;  %1346 = vmatmul.mubr.bf16.gmra.mrb[12].mxu1 %v2392_v28 }
  0x9b   :  { %2005 = vmatprep.mubr.msk.bf16.mxu0 %vm919_vm0, %v2393_v29  ;;  %2013 = vmatprep.mubr.msk.bf16.mxu1 %vm919_vm0, %v2393_v29 }
  0x9c   :  { %2046 = vmatpush3.bf16.msra.mxu0 %v2418_v30  ;;  %2111 = vmatpush3.bf16.msra.mxu1 %v2418_v30 }
  0x9d   :  { %2047 = vmatprep.subr.bf16.mxu0 %v2419_v38  ;;  %2104 = vmatprep.subr.bf16.mxu1 %v2419_v38 }
  0xa0   :  { %2048 = vmatpush3.bf16.msra.mxu0 %v2420_v39  ;;  %2112 = vmatpush3.bf16.msra.mxu1 %v2420_v39 }
  0xa2   :  { %1130 = vmatmul.mubr.bf16.gmra.mrb[16].mxu0 %v2395_v31  ;;  %1356 = vmatmul.mubr.bf16.gmra.mrb[16].mxu1 %v2395_v31 }
  0xa3   :  { %2006 = vmatprep.mubr.msk.bf16.mxu0 %vm919_vm0, %v2396_v32  ;;  %2014 = vmatprep.mubr.msk.bf16.mxu1 %vm919_vm0, %v2396_v32 }
  0xaa   :  { %1140 = vmatmul.mubr.bf16.gmra.mrb[20].mxu0 %v2398_v33  ;;  %1366 = vmatmul.mubr.bf16.gmra.mrb[20].mxu1 %v2398_v33 }
  0xab   :  { %2007 = vmatprep.mubr.msk.bf16.mxu0 %vm919_vm0, %v2399_v34  ;;  %2015 = vmatprep.mubr.msk.bf16.mxu1 %vm919_vm0, %v2399_v34 }
  0xb2   :  { %1150 = vmatmul.mubr.bf16.gmra.mrb[24].mxu0 %v2401_v35  ;;  %1376 = vmatmul.mubr.bf16.gmra.mrb[24].mxu1 %v2401_v35 }
  0xb3   :  { %2008 = vmatprep.mubr.msk.bf16.mxu0 %vm919_vm0, %v2402_v36  ;;  %2016 = vmatprep.mubr.msk.bf16.mxu1 %vm919_vm0, %v2402_v36 }
  0xba   :  { %1160 = vmatmul.mubr.bf16.gmra.mrb[28].mxu0 %v2404_v37  ;;  %1386 = vmatmul.mubr.bf16.gmra.mrb[28].mxu1 %v2404_v37 }
 0x155   :  { %v1091_v40 = vpop.f32.mrb[0].mxu0  ;;  %v1317_v41 = vpop.f32.mrb[0].mxu1 }
 0x156   :  { %v1396_v42 = vmul.f32 %v1091_v40, %v1091_v40  ;;  %v1428_v43 = vmul.f32 %v1317_v41, %v1317_v41  ;;  %v1093_v44 = vpop.f32.mrb[1].mxu0  ;;  %v1319_v45 = vpop.f32.mrb[1].mxu1 }
 0x157   :  { %v1397_v46 = vmul.f32 %v1093_v44, %v1093_v44  ;;  %v1429_v47 = vmul.f32 %v1319_v45, %v1319_v45  ;;  %v1095_v48 = vpop.f32.mrb[2].mxu0  ;;  %v1321_v49 = vpop.f32.mrb[2].mxu1 }
 0x158   :  { %v1460_v50 = vadd.f32 %v1428_v43, %v1396_v42  ;;  %v1398_v51 = vmul.f32 %v1095_v48, %v1095_v48  ;;  %v1430_v52 = vmul.f32 %v1321_v49, %v1321_v49  ;;  %v1097_v53 = vpop.f32.mrb[3].mxu0  ;;  %v1323_v54 = vpop.f32.mrb[3].mxu1 }
 0x159   :  { %v1461_v55 = vadd.f32 %v1429_v47, %v1397_v46  ;;  %v1399_v56 = vmul.f32 %v1097_v53, %v1097_v53  ;;  %v1431_v57 = vmul.f32 %v1323_v54, %v1323_v54 }
 0x15a   :  { %v1462_v58 = vadd.f32 %v1430_v52, %v1398_v51 }
 0x15b   :  { %v1463_v59 = vadd.f32 %v1431_v57, %v1399_v56 }
 0x15c   :  { %v1492_v60 = vpack.c.bf16 %v1462_v58, %v1460_v50 }
 0x15d   :  { %v1101_v61 = vpop.f32.mrb[4].mxu0  ;;  %v1327_v62 = vpop.f32.mrb[4].mxu1  ;;  %v1493_v63 = vpack.c.bf16 %v1463_v59, %v1461_v55 }
 0x15e   :  { %v1400_v0 = vmul.f32 %v1101_v61, %v1101_v61  ;;  %v1432_v1 = vmul.f32 %v1327_v62, %v1327_v62  ;;  %v1103_v2 = vpop.f32.mrb[5].mxu0  ;;  %v1329_v3 = vpop.f32.mrb[5].mxu1 }
 0x15f   :  { %v1401_v4 = vmul.f32 %v1103_v2, %v1103_v2  ;;  %v1433_v5 = vmul.f32 %v1329_v3, %v1329_v3  ;;  %v1105_v6 = vpop.f32.mrb[6].mxu0  ;;  %v1331_v7 = vpop.f32.mrb[6].mxu1  ;;  %1668 = vmatprep.mubr.bf16.mxu0 %v1493_v63 }
 0x160   :  { %v1464_v8 = vadd.f32 %v1432_v1, %v1400_v0  ;;  %v1402_v9 = vmul.f32 %v1105_v6, %v1105_v6  ;;  %v1434_v10 = vmul.f32 %v1331_v7, %v1331_v7  ;;  %v1107_v11 = vpop.f32.mrb[7].mxu0  ;;  %v1333_v12 = vpop.f32.mrb[7].mxu1  ;;  %1669 = vmatmul.mubr.bf16.vlgmr.msra.gmra.mrb[32].mxu0 %v1492_v60 }
 0x161   :  { %v1465_v13 = vadd.f32 %v1433_v5, %v1401_v4  ;;  %v1403_v14 = vmul.f32 %v1107_v11, %v1107_v11  ;;  %v1435_v15 = vmul.f32 %v1333_v12, %v1333_v12 }
 0x162   :  { %v1466_v16 = vadd.f32 %v1434_v10, %v1402_v9 }
 0x163   :  { %v1467_v17 = vadd.f32 %v1435_v15, %v1403_v14 }
 0x164   :  { %v1494_v18 = vpack.c.bf16 %v1466_v16, %v1464_v8 }
 0x165   :  { %v1111_v19 = vpop.f32.mrb[8].mxu0  ;;  %v1337_v20 = vpop.f32.mrb[8].mxu1  ;;  %v1495_v21 = vpack.c.bf16 %v1467_v17, %v1465_v13 }
 0x166   :  { %v1404_v22 = vmul.f32 %v1111_v19, %v1111_v19  ;;  %v1436_v23 = vmul.f32 %v1337_v20, %v1337_v20  ;;  %v1113_v24 = vpop.f32.mrb[9].mxu0  ;;  %v1339_v25 = vpop.f32.mrb[9].mxu1 }
 0x167   :  { %v1405_v26 = vmul.f32 %v1113_v24, %v1113_v24  ;;  %v1437_v27 = vmul.f32 %v1339_v25, %v1339_v25  ;;  %v1115_v28 = vpop.f32.mrb[10].mxu0  ;;  %v1341_v29 = vpop.f32.mrb[10].mxu1  ;;  %1676 = vmatprep.mubr.bf16.mxu0 %v1495_v21 }
 0x168   :  { %v1468_v30 = vadd.f32 %v1436_v23, %v1404_v22  ;;  %v1406_v31 = vmul.f32 %v1115_v28, %v1115_v28  ;;  %v1438_v32 = vmul.f32 %v1341_v29, %v1341_v29  ;;  %v1117_v33 = vpop.f32.mrb[11].mxu0  ;;  %v1343_v34 = vpop.f32.mrb[11].mxu1  ;;  %1677 = vmatmul.mubr.bf16.gmra.mrb[36].mxu0 %v1494_v18 }
 0x169   :  { %v1469_v35 = vadd.f32 %v1437_v27, %v1405_v26  ;;  %v1407_v36 = vmul.f32 %v1117_v33, %v1117_v33  ;;  %v1439_v37 = vmul.f32 %v1343_v34, %v1343_v34 }
 0x16a   :  { %v1470_v38 = vadd.f32 %v1438_v32, %v1406_v31 }
 0x16b   :  { %v1471_v39 = vadd.f32 %v1439_v37, %v1407_v36 }
 0x16c   :  { %v1496_v40 = vpack.c.bf16 %v1470_v38, %v1468_v30 }
 0x16d   :  { %v1121_v41 = vpop.f32.mrb[12].mxu0  ;;  %v1347_v42 = vpop.f32.mrb[12].mxu1  ;;  %v1497_v43 = vpack.c.bf16 %v1471_v39, %v1469_v35 }
 0x16e   :  { %v1408_v44 = vmul.f32 %v1121_v41, %v1121_v41  ;;  %v1440_v45 = vmul.f32 %v1347_v42, %v1347_v42  ;;  %v1123_v46 = vpop.f32.mrb[13].mxu0  ;;  %v1349_v47 = vpop.f32.mrb[13].mxu1 }
 0x16f   :  { %v1409_v48 = vmul.f32 %v1123_v46, %v1123_v46  ;;  %v1441_v49 = vmul.f32 %v1349_v47, %v1349_v47  ;;  %v1125_v50 = vpop.f32.mrb[14].mxu0  ;;  %v1351_v51 = vpop.f32.mrb[14].mxu1  ;;  %1684 = vmatprep.mubr.bf16.mxu0 %v1497_v43 }
 0x170   :  { %v1472_v52 = vadd.f32 %v1440_v45, %v1408_v44  ;;  %v1410_v53 = vmul.f32 %v1125_v50, %v1125_v50  ;;  %v1442_v54 = vmul.f32 %v1351_v51, %v1351_v51  ;;  %v1127_v55 = vpop.f32.mrb[15].mxu0  ;;  %v1353_v56 = vpop.f32.mrb[15].mxu1  ;;  %1685 = vmatmul.mubr.bf16.gmra.mrb[40].mxu0 %v1496_v40 }
 0x171   :  { %v1473_v57 = vadd.f32 %v1441_v49, %v1409_v48  ;;  %v1411_v58 = vmul.f32 %v1127_v55, %v1127_v55  ;;  %v1443_v59 = vmul.f32 %v1353_v56, %v1353_v56 }
 0x172   :  { %v1474_v60 = vadd.f32 %v1442_v54, %v1410_v53 }
 0x173   :  { %v1475_v61 = vadd.f32 %v1443_v59, %v1411_v58 }
 0x174   :  { %v1498_v62 = vpack.c.bf16 %v1474_v60, %v1472_v52 }
 0x175   :  { %v1131_v63 = vpop.f32.mrb[16].mxu0  ;;  %v1357_v0 = vpop.f32.mrb[16].mxu1  ;;  %v1499_v1 = vpack.c.bf16 %v1475_v61, %v1473_v57 }
 0x176   :  { %v1412_v2 = vmul.f32 %v1131_v63, %v1131_v63  ;;  %v1444_v3 = vmul.f32 %v1357_v0, %v1357_v0  ;;  %v1133_v4 = vpop.f32.mrb[17].mxu0  ;;  %v1359_v5 = vpop.f32.mrb[17].mxu1 }
 0x177   :  { %v1413_v6 = vmul.f32 %v1133_v4, %v1133_v4  ;;  %v1445_v7 = vmul.f32 %v1359_v5, %v1359_v5  ;;  %v1135_v8 = vpop.f32.mrb[18].mxu0  ;;  %v1361_v9 = vpop.f32.mrb[18].mxu1  ;;  %1692 = vmatprep.mubr.bf16.mxu0 %v1499_v1 }
 0x178   :  { %v1476_v10 = vadd.f32 %v1444_v3, %v1412_v2  ;;  %v1414_v11 = vmul.f32 %v1135_v8, %v1135_v8  ;;  %v1446_v12 = vmul.f32 %v1361_v9, %v1361_v9  ;;  %v1137_v13 = vpop.f32.mrb[19].mxu0  ;;  %v1363_v14 = vpop.f32.mrb[19].mxu1  ;;  %1693 = vmatmul.mubr.bf16.gmra.mrb[44].mxu0 %v1498_v62 }
 0x179   :  { %v1477_v15 = vadd.f32 %v1445_v7, %v1413_v6  ;;  %v1415_v16 = vmul.f32 %v1137_v13, %v1137_v13  ;;  %v1447_v17 = vmul.f32 %v1363_v14, %v1363_v14 }
 0x17a   :  { %v1478_v18 = vadd.f32 %v1446_v12, %v1414_v11 }
 0x17b   :  { %v1479_v19 = vadd.f32 %v1447_v17, %v1415_v16 }
 0x17c   :  { %v1500_v20 = vpack.c.bf16 %v1478_v18, %v1476_v10 }
 0x17d   :  { %v1141_v21 = vpop.f32.mrb[20].mxu0  ;;  %v1367_v22 = vpop.f32.mrb[20].mxu1  ;;  %v1501_v23 = vpack.c.bf16 %v1479_v19, %v1477_v15 }
 0x17e   :  { %v1416_v24 = vmul.f32 %v1141_v21, %v1141_v21  ;;  %v1448_v25 = vmul.f32 %v1367_v22, %v1367_v22  ;;  %v1143_v26 = vpop.f32.mrb[21].mxu0  ;;  %v1369_v27 = vpop.f32.mrb[21].mxu1 }
 0x17f   :  { %v1417_v28 = vmul.f32 %v1143_v26, %v1143_v26  ;;  %v1449_v29 = vmul.f32 %v1369_v27, %v1369_v27  ;;  %v1145_v30 = vpop.f32.mrb[22].mxu0  ;;  %v1371_v31 = vpop.f32.mrb[22].mxu1  ;;  %1700 = vmatprep.mubr.bf16.mxu1 %v1501_v23 }
 0x180   :  { %v1480_v32 = vadd.f32 %v1448_v25, %v1416_v24  ;;  %v1418_v33 = vmul.f32 %v1145_v30, %v1145_v30  ;;  %v1450_v34 = vmul.f32 %v1371_v31, %v1371_v31  ;;  %v1147_v35 = vpop.f32.mrb[23].mxu0  ;;  %v1373_v36 = vpop.f32.mrb[23].mxu1  ;;  %1701 = vmatmul.mubr.bf16.vlgmr.msra.gmra.mrb[32].mxu1 %v1500_v20 }
 0x181   :  { %v1481_v37 = vadd.f32 %v1449_v29, %v1417_v28  ;;  %v1419_v38 = vmul.f32 %v1147_v35, %v1147_v35  ;;  %v1451_v39 = vmul.f32 %v1373_v36, %v1373_v36 }
 0x182   :  { %v1482_v40 = vadd.f32 %v1450_v34, %v1418_v33 }
 0x183   :  { %v1483_v41 = vadd.f32 %v1451_v39, %v1419_v38 }
 0x184   :  { %v1502_v42 = vpack.c.bf16 %v1482_v40, %v1480_v32 }
 0x185   :  { %v1151_v43 = vpop.f32.mrb[24].mxu0  ;;  %v1377_v44 = vpop.f32.mrb[24].mxu1  ;;  %v1503_v45 = vpack.c.bf16 %v1483_v41, %v1481_v37 }
 0x186   :  { %v1420_v46 = vmul.f32 %v1151_v43, %v1151_v43  ;;  %v1452_v47 = vmul.f32 %v1377_v44, %v1377_v44  ;;  %v1153_v48 = vpop.f32.mrb[25].mxu0  ;;  %v1379_v49 = vpop.f32.mrb[25].mxu1 }
 0x187   :  { %v1421_v50 = vmul.f32 %v1153_v48, %v1153_v48  ;;  %v1453_v51 = vmul.f32 %v1379_v49, %v1379_v49  ;;  %v1155_v52 = vpop.f32.mrb[26].mxu0  ;;  %v1381_v53 = vpop.f32.mrb[26].mxu1  ;;  %1708 = vmatprep.mubr.bf16.mxu1 %v1503_v45 }
 0x188   :  { %v1484_v54 = vadd.f32 %v1452_v47, %v1420_v46  ;;  %v1422_v55 = vmul.f32 %v1155_v52, %v1155_v52  ;;  %v1454_v56 = vmul.f32 %v1381_v53, %v1381_v53  ;;  %v1157_v57 = vpop.f32.mrb[27].mxu0  ;;  %v1383_v58 = vpop.f32.mrb[27].mxu1  ;;  %1709 = vmatmul.mubr.bf16.gmra.mrb[36].mxu1 %v1502_v42 }
 0x189   :  { %v1485_v59 = vadd.f32 %v1453_v51, %v1421_v50  ;;  %v1423_v60 = vmul.f32 %v1157_v57, %v1157_v57  ;;  %v1455_v61 = vmul.f32 %v1383_v58, %v1383_v58 }
 0x18a   :  { %v1486_v62 = vadd.f32 %v1454_v56, %v1422_v55 }
 0x18b   :  { %v1487_v63 = vadd.f32 %v1455_v61, %v1423_v60 }
 0x18c   :  { %v1504_v0 = vpack.c.bf16 %v1486_v62, %v1484_v54 }
 0x18d   :  { %v1161_v1 = vpop.f32.mrb[28].mxu0  ;;  %v1387_v2 = vpop.f32.mrb[28].mxu1  ;;  %v1505_v3 = vpack.c.bf16 %v1487_v63, %v1485_v59 }
 0x18e   :  { %v1424_v4 = vmul.f32 %v1161_v1, %v1161_v1  ;;  %v1456_v5 = vmul.f32 %v1387_v2, %v1387_v2  ;;  %v1163_v6 = vpop.f32.mrb[29].mxu0  ;;  %v1389_v7 = vpop.f32.mrb[29].mxu1 }
 0x18f   :  { %v1425_v8 = vmul.f32 %v1163_v6, %v1163_v6  ;;  %v1457_v9 = vmul.f32 %v1389_v7, %v1389_v7  ;;  %v1165_v10 = vpop.f32.mrb[30].mxu0  ;;  %v1391_v11 = vpop.f32.mrb[30].mxu1  ;;  %1716 = vmatprep.mubr.bf16.mxu1 %v1505_v3 }
 0x190   :  { %v1488_v12 = vadd.f32 %v1456_v5, %v1424_v4  ;;  %v1426_v13 = vmul.f32 %v1165_v10, %v1165_v10  ;;  %v1458_v14 = vmul.f32 %v1391_v11, %v1391_v11  ;;  %v1167_v15 = vpop.f32.mrb[31].mxu0  ;;  %v1393_v16 = vpop.f32.mrb[31].mxu1  ;;  %1717 = vmatmul.mubr.bf16.gmra.mrb[40].mxu1 %v1504_v0 }
 0x191   :  { %v1489_v17 = vadd.f32 %v1457_v9, %v1425_v8  ;;  %v1427_v18 = vmul.f32 %v1167_v15, %v1167_v15  ;;  %v1459_v19 = vmul.f32 %v1393_v16, %v1393_v16 }
 0x192   :  { %v1490_v20 = vadd.f32 %v1458_v14, %v1426_v13 }
 0x193   :  { %v1491_v21 = vadd.f32 %v1459_v19, %v1427_v18 }
 0x194   :  { %v1506_v22 = vpack.c.bf16 %v1490_v20, %v1488_v12 }
 0x195   :  { %v1507_v23 = vpack.c.bf16 %v1491_v21, %v1489_v17 }
 0x197   :  { %1724 = vmatprep.mubr.bf16.mxu1 %v1507_v23 }
 0x198   :  { %1725 = vmatmul.mubr.bf16.gmra.mrb[44].mxu1 %v1506_v22 }
 0x233   :  { %v2049_v24 = vpop.f32.mrb[32].mxu0 }
 0x234   :  { %v2050_v25 = vpop.f32.mrb[33].mxu0 }
 0x235   :  { %v2051_v26 = vadd.f32 %v2050_v25, %v2049_v24  ;;  %v2052_v27 = vpop.f32.mrb[34].mxu0 }
 0x236   :  { %v2053_v28 = vpop.f32.mrb[35].mxu0 }
 0x237   :  { %v1733_v29 = vmax.f32 %v2051_v26, 1e-10  ;;  %v2054_v30 = vadd.f32 %v2053_v28, %v2052_v27 }
 0x239   :  { %2421 = vlog2.f32 %v1733_v29  ;;  %v1734_v31 = vmax.f32 %v2054_v30, 1e-10 }
 0x23b   :  { %2423 = vlog2.f32 %v1734_v31  ;;  %v2055_v32 = vpop.f32.mrb[36].mxu0 }
 0x23c   :  { %v2056_v33 = vpop.f32.mrb[37].mxu0 }
 0x23d   :  { %v2057_v34 = vadd.f32 %v2056_v33, %v2055_v32  ;;  %v2058_v35 = vpop.f32.mrb[38].mxu0 }
 0x23e   :  { %v2059_v36 = vpop.f32.mrb[39].mxu0 }
 0x23f   :  { %v1735_v37 = vmax.f32 %v2057_v34, 1e-10  ;;  %v2060_v38 = vadd.f32 %v2059_v36, %v2058_v35 }
 0x241   :  { %2425 = vlog2.f32 %v1735_v37  ;;  %v1736_v39 = vmax.f32 %v2060_v38, 1e-10 }
 0x243   :  { %v2422_v40 = vpop.eup %2421  ;;  %2427 = vlog2.f32 %v1736_v39  ;;  %v2061_v41 = vpop.f32.mrb[40].mxu0 }
 0x244   :  { %v2062_v42 = vpop.f32.mrb[41].mxu0  ;;  %v1750_v43 = vmul.f32 0.6931472, %v2422_v40 }
 0x245   :  { %v2424_v44 = vpop.eup %2423  ;;  %v2063_v45 = vadd.f32 %v2062_v42, %v2061_v41  ;;  %v2064_v46 = vpop.f32.mrb[42].mxu0 }
 0x246   :  { %v2065_v47 = vpop.f32.mrb[43].mxu0  ;;  %v1781_v48 = vmul.f32 0.4342945, %v1750_v43  ;;  %v1752_v49 = vmul.f32 0.6931472, %v2424_v44 }
 0x247   :  { %v1737_v50 = vmax.f32 %v2063_v45, 1e-10  ;;  %v2066_v51 = vadd.f32 %v2065_v47, %v2064_v46 }
 0x248   :  { %1797 = vxpose.xlu0.b32.start [1/16] %v1781_v48, 128  ;;  %v1782_v53 = vmul.f32 0.4342945, %v1752_v49 }
 0x249   :  { %2429 = vlog2.f32 %v1737_v50  ;;  %v1738_v52 = vmax.f32 %v2066_v51, 1e-10 }
 0x24b   :  { %v2426_v54 = vpop.eup %2425  ;;  %2431 = vlog2.f32 %v1738_v52  ;;  %v2067_v55 = vpop.f32.mrb[44].mxu0 }
 0x24c   :  { %v2068_v56 = vpop.f32.mrb[45].mxu0  ;;  %1798 = vxpose.xlu0.b32.cont [2/16] %v1782_v53, 128  ;;  %v1754_v57 = vmul.f32 0.6931472, %v2426_v54 }
 0x24d   :  { %v2428_v58 = vpop.eup %2427  ;;  %v2069_v59 = vadd.f32 %v2068_v56, %v2067_v55  ;;  %v2070_v60 = vpop.f32.mrb[46].mxu0 }
 0x24e   :  { %v2071_v61 = vpop.f32.mrb[47].mxu0  ;;  %v1783_v62 = vmul.f32 0.4342945, %v1754_v57  ;;  %v1756_v63 = vmul.f32 0.6931472, %v2428_v58 }
 0x24f   :  { %v1739_v0 = vmax.f32 %v2069_v59, 1e-10  ;;  %v2072_v1 = vadd.f32 %v2071_v61, %v2070_v60 }
 0x250   :  { %1799 = vxpose.xlu0.b32.cont [3/16] %v1783_v62, 128  ;;  %v1784_v3 = vmul.f32 0.4342945, %v1756_v63 }
 0x251   :  { %2433 = vlog2.f32 %v1739_v0  ;;  %v1740_v2 = vmax.f32 %v2072_v1, 1e-10 }
 0x253   :  { %v2430_v4 = vpop.eup %2429  ;;  %2435 = vlog2.f32 %v1740_v2  ;;  %v2073_v5 = vpop.f32.mrb[32].mxu1 }
 0x254   :  { %v2074_v6 = vpop.f32.mrb[33].mxu1  ;;  %1800 = vxpose.xlu0.b32.cont [4/16] %v1784_v3, 128  ;;  %v1758_v7 = vmul.f32 0.6931472, %v2430_v4 }
 0x255   :  { %v2432_v8 = vpop.eup %2431  ;;  %v2075_v9 = vadd.f32 %v2074_v6, %v2073_v5  ;;  %v2076_v10 = vpop.f32.mrb[34].mxu1 }
 0x256   :  { %v2077_v11 = vpop.f32.mrb[35].mxu1  ;;  %v1785_v12 = vmul.f32 0.4342945, %v1758_v7  ;;  %v1760_v13 = vmul.f32 0.6931472, %v2432_v8 }
 0x257   :  { %v1741_v14 = vmax.f32 %v2075_v9, 1e-10  ;;  %v2078_v15 = vadd.f32 %v2077_v11, %v2076_v10 }
 0x258   :  { %1801 = vxpose.xlu0.b32.cont [5/16] %v1785_v12, 128  ;;  %v1786_v17 = vmul.f32 0.4342945, %v1760_v13 }
 0x259   :  { %2437 = vlog2.f32 %v1741_v14  ;;  %v1742_v16 = vmax.f32 %v2078_v15, 1e-10 }
 0x25b   :  { %v2434_v18 = vpop.eup %2433  ;;  %2439 = vlog2.f32 %v1742_v16  ;;  %v2079_v19 = vpop.f32.mrb[36].mxu1 }
 0x25c   :  { %v2080_v20 = vpop.f32.mrb[37].mxu1  ;;  %1802 = vxpose.xlu0.b32.cont [6/16] %v1786_v17, 128  ;;  %v1762_v21 = vmul.f32 0.6931472, %v2434_v18 }
 0x25d   :  { %v2436_v22 = vpop.eup %2435  ;;  %v2081_v23 = vadd.f32 %v2080_v20, %v2079_v19  ;;  %v2082_v24 = vpop.f32.mrb[38].mxu1 }
 0x25e   :  { %v2083_v25 = vpop.f32.mrb[39].mxu1  ;;  %v1787_v26 = vmul.f32 0.4342945, %v1762_v21  ;;  %v1764_v27 = vmul.f32 0.6931472, %v2436_v22 }
 0x25f   :  { %v1743_v28 = vmax.f32 %v2081_v23, 1e-10  ;;  %v2084_v29 = vadd.f32 %v2083_v25, %v2082_v24 }
 0x260   :  { %1803 = vxpose.xlu0.b32.cont [7/16] %v1787_v26, 128  ;;  %v1788_v31 = vmul.f32 0.4342945, %v1764_v27 }
 0x261   :  { %2441 = vlog2.f32 %v1743_v28  ;;  %v1744_v30 = vmax.f32 %v2084_v29, 1e-10 }
 0x263   :  { %v2438_v32 = vpop.eup %2437  ;;  %2443 = vlog2.f32 %v1744_v30  ;;  %v2085_v33 = vpop.f32.mrb[40].mxu1 }
 0x264   :  { %v2086_v34 = vpop.f32.mrb[41].mxu1  ;;  %1804 = vxpose.xlu0.b32.cont [8/16] %v1788_v31, 128  ;;  %v1766_v35 = vmul.f32 0.6931472, %v2438_v32 }
 0x265   :  { %v2440_v36 = vpop.eup %2439  ;;  %v2087_v37 = vadd.f32 %v2086_v34, %v2085_v33  ;;  %v2088_v38 = vpop.f32.mrb[42].mxu1 }
 0x266   :  { %v2089_v39 = vpop.f32.mrb[43].mxu1  ;;  %v1789_v40 = vmul.f32 0.4342945, %v1766_v35  ;;  %v1768_v41 = vmul.f32 0.6931472, %v2440_v36 }
 0x267   :  { %v1745_v42 = vmax.f32 %v2087_v37, 1e-10  ;;  %v2090_v43 = vadd.f32 %v2089_v39, %v2088_v38 }
 0x268   :  { %1805 = vxpose.xlu0.b32.cont [9/16] %v1789_v40, 128  ;;  %v1790_v45 = vmul.f32 0.4342945, %v1768_v41 }
 0x269   :  { %2445 = vlog2.f32 %v1745_v42  ;;  %v1746_v44 = vmax.f32 %v2090_v43, 1e-10 }
 0x26b   :  { %v2442_v46 = vpop.eup %2441  ;;  %2447 = vlog2.f32 %v1746_v44  ;;  %v2091_v47 = vpop.f32.mrb[44].mxu1 }
 0x26c   :  { %v2092_v48 = vpop.f32.mrb[45].mxu1  ;;  %1806 = vxpose.xlu0.b32.cont [10/16] %v1790_v45, 128  ;;  %v1770_v49 = vmul.f32 0.6931472, %v2442_v46 }
 0x26d   :  { %v2444_v50 = vpop.eup %2443  ;;  %v2093_v51 = vadd.f32 %v2092_v48, %v2091_v47  ;;  %v2094_v52 = vpop.f32.mrb[46].mxu1 }
 0x26e   :  { %v2095_v53 = vpop.f32.mrb[47].mxu1  ;;  %v1791_v54 = vmul.f32 0.4342945, %v1770_v49  ;;  %v1772_v55 = vmul.f32 0.6931472, %v2444_v50 }
 0x26f   :  { %v1747_v56 = vmax.f32 %v2093_v51, 1e-10  ;;  %v2096_v57 = vadd.f32 %v2095_v53, %v2094_v52 }
 0x270   :  { %1807 = vxpose.xlu0.b32.cont [11/16] %v1791_v54, 128  ;;  %v1792_v59 = vmul.f32 0.4342945, %v1772_v55 }
 0x271   :  { %2449 = vlog2.f32 %v1747_v56  ;;  %v1748_v58 = vmax.f32 %v2096_v57, 1e-10 }
 0x273   :  { %v2446_v60 = vpop.eup %2445  ;;  %2451 = vlog2.f32 %v1748_v58 }
 0x274   :  { %1808 = vxpose.xlu0.b32.cont [12/16] %v1792_v59, 128  ;;  %v1774_v61 = vmul.f32 0.6931472, %v2446_v60 }
 0x275   :  { %v2448_v62 = vpop.eup %2447 }
 0x276   :  { %v1793_v63 = vmul.f32 0.4342945, %v1774_v61  ;;  %v1776_v0 = vmul.f32 0.6931472, %v2448_v62 }
 0x278   :  { %1809 = vxpose.xlu0.b32.cont [13/16] %v1793_v63, 128  ;;  %v1794_v1 = vmul.f32 0.4342945, %v1776_v0 }
 0x27b   :  { %v2450_v2 = vpop.eup %2449 }
 0x27c   :  { %1810 = vxpose.xlu0.b32.cont [14/16] %v1794_v1, 128  ;;  %v1778_v3 = vmul.f32 0.6931472, %v2450_v2 }
 0x27d   :  { %v2452_v4 = vpop.eup %2451 }
 0x27e   :  { %v1795_v5 = vmul.f32 0.4342945, %v1778_v3  ;;  %v1780_v6 = vmul.f32 0.6931472, %v2452_v4 }
 0x280   :  { %1811 = vxpose.xlu0.b32.cont [15/16] %v1795_v5, 128  ;;  %v1796_v7 = vmul.f32 0.4342945, %v1780_v6 }
 0x284   :  { %1812 = vxpose.xlu0.b32.end [16/16] %v1796_v7, 128 }
 0x2c8   :  { %v1813_v8 = vpop.trf.xlu0 }
 0x2c9   :  { %1829 = vst [vmem:[%s3044_s3] sm:$0xff] %v1813_v8 }
 0x2cc   :  { %v1814_v9 = vpop.trf.xlu0 }
 0x2cd   :  { %1830 = vst [vmem:[%s3044_s3 + $0x8] sm:$0xff] %v1814_v9 }
 0x2d0   :  { %v1815_v10 = vpop.trf.xlu0 }
 0x2d1   :  { %1831 = vst [vmem:[%s3044_s3 + $0x10] sm:$0xff] %v1815_v10 }
 0x2d4   :  { %v1816_v11 = vpop.trf.xlu0 }
 0x2d5   :  { %1832 = vst [vmem:[%s3044_s3 + $0x18] sm:$0xff] %v1816_v11 }
 0x2d8   :  { %v1817_v12 = vpop.trf.xlu0 }
 0x2d9   :  { %1833 = vst [vmem:[%s3044_s3 + $0x20] sm:$0xff] %v1817_v12 }
 0x2dc   :  { %v1818_v13 = vpop.trf.xlu0 }
 0x2dd   :  { %1834 = vst [vmem:[%s3044_s3 + $0x28] sm:$0xff] %v1818_v13 }
 0x2e0   :  { %v1819_v14 = vpop.trf.xlu0 }
 0x2e1   :  { %1835 = vst [vmem:[%s3044_s3 + $0x30] sm:$0xff] %v1819_v14 }
 0x2e4   :  { %v1820_v15 = vpop.trf.xlu0 }
 0x2e5   :  { %1836 = vst [vmem:[%s3044_s3 + $0x38] sm:$0xff] %v1820_v15 }
 0x2e8   :  { %v1821_v16 = vpop.trf.xlu0 }
 0x2e9   :  { %1837 = vst [vmem:[%s3044_s3 + $0x40] sm:$0xff] %v1821_v16 }
 0x2ec   :  { %v1822_v17 = vpop.trf.xlu0 }
 0x2ed   :  { %1838 = vst [vmem:[%s3044_s3 + $0x48] sm:$0xff] %v1822_v17 }
 0x2f0   :  { %v1823_v18 = vpop.trf.xlu0 }
 0x2f1   :  { %1839 = vst [vmem:[%s3044_s3 + $0x50] sm:$0xff] %v1823_v18 }
 0x2f4   :  { %v1824_v19 = vpop.trf.xlu0 }
 0x2f5   :  { %1840 = vst [vmem:[%s3044_s3 + $0x58] sm:$0xff] %v1824_v19 }
 0x2f8   :  { %v1825_v20 = vpop.trf.xlu0 }
 0x2f9   :  { %1841 = vst [vmem:[%s3044_s3 + $0x60] sm:$0xff] %v1825_v20 }
 0x2fc   :  { %v1826_v21 = vpop.trf.xlu0 }
 0x2fd   :  { %1842 = vst [vmem:[%s3044_s3 + $0x68] sm:$0xff] %v1826_v21 }
 0x300   :  { %v1827_v22 = vpop.trf.xlu0 }
 0x301   :  { %1843 = vst [vmem:[%s3044_s3 + $0x70] sm:$0xff] %v1827_v22 }
 0x304   :  { %v1828_v23 = vpop.trf.xlu0 }
 0x305   :  { %1844 = vst [vmem:[%s3044_s3 + $0x78] sm:$0xff] %v1828_v23 }

</bundles_post_ra>
